<compile_context>
chip_gen: v5e
topology: v5e:2x2
jax: 0.10.0
libtpu: 0.0.40
codegen_flags: <defaults>
</compile_context>

<pallas_src>
import functools

import jax
import jax.numpy as jnp
from jax import lax
from jax.experimental import pallas as pl
from jax.experimental.pallas import tpu as pltpu


# ----------------------------------------------------------------------------
# Pallas kernels: tiled (x @ w) with f32 accumulation and a fused epilogue.
#   relu_cols: None  -> no ReLU
#              -1    -> ReLU on all columns
#              k>=0  -> ReLU on global output columns [0, k) only (used for
#                       the fused conv1|shortcut matmul)
# ----------------------------------------------------------------------------
def _epilogue(y, *, tn, relu_cols, r=None):
    if r is not None:
        y = y + r.astype(jnp.float32)
    if relu_cols is not None:
        if relu_cols < 0:
            y = jnp.maximum(y, 0.0)
        else:
            col = lax.broadcasted_iota(jnp.int32, y.shape, 1) + pl.program_id(1) * tn
            y = jnp.where(col < relu_cols, jnp.maximum(y, 0.0), y)
    return y


def _mm_kernel_single_k(x_ref, w_ref, o_ref, *, tn, relu_cols):
    y = jnp.dot(x_ref[...], w_ref[...], preferred_element_type=jnp.float32)
    o_ref[...] = _epilogue(y, tn=tn, relu_cols=relu_cols).astype(o_ref.dtype)


def _mm_res_kernel_single_k(x_ref, w_ref, r_ref, o_ref, *, tn, relu_cols):
    y = jnp.dot(x_ref[...], w_ref[...], preferred_element_type=jnp.float32)
    o_ref[...] = _epilogue(y, tn=tn, relu_cols=relu_cols,
                           r=r_ref[...]).astype(o_ref.dtype)


def _mm_kernel_tiled_k(x_ref, w_ref, o_ref, acc_ref, *, tn, relu_cols):
    @pl.when(pl.program_id(2) == 0)
    def _init():
        acc_ref[...] = jnp.zeros_like(acc_ref)

    acc_ref[...] += jnp.dot(x_ref[...], w_ref[...],
                            preferred_element_type=jnp.float32)

    @pl.when(pl.program_id(2) == pl.num_programs(2) - 1)
    def _fin():
        o_ref[...] = _epilogue(acc_ref[...], tn=tn,
                               relu_cols=relu_cols).astype(o_ref.dtype)


def _mm_res_kernel_tiled_k(x_ref, w_ref, r_ref, o_ref, acc_ref, *, tn, relu_cols):
    @pl.when(pl.program_id(2) == 0)
    def _init():
        acc_ref[...] = jnp.zeros_like(acc_ref)

    acc_ref[...] += jnp.dot(x_ref[...], w_ref[...],
                            preferred_element_type=jnp.float32)

    @pl.when(pl.program_id(2) == pl.num_programs(2) - 1)
    def _fin():
        o_ref[...] = _epilogue(acc_ref[...], tn=tn, relu_cols=relu_cols,
                               r=r_ref[...]).astype(o_ref.dtype)


# ----------------------------------------------------------------------------
# Matmul wrapper
# ----------------------------------------------------------------------------
def _round_up(x, m):
    return ((x + m - 1) // m) * m


def _pad2d(a, rows, cols):
    r, c = a.shape
    if r == rows and c == cols:
        return a
    return jnp.pad(a, ((0, rows - r), (0, cols - c)))


def fused_matmul(x, w, residual=None, relu_cols=None, out_dtype=jnp.float32,
                 max_tm=512, max_tk=2048, max_tn=1024):
    """x (M,K) @ w (K,N) (+ residual) with optional column-masked ReLU.

    x should already be in the desired MXU compute dtype (bf16) with K padded
    to a multiple of 128 (im2col3x3 does that for free); w's K dimension may
    be smaller and is zero-padded to match.  Zero padding is exact for
    matmul; the result is sliced back to (M, N).
    """
    M, Kx = x.shape
    Kw, N = w.shape
    assert Kw <= Kx, (Kw, Kx)

    # ---- tile selection (lane-dense, (8,128)-aligned) ----
    Kp0 = _round_up(Kx, 128)
    tk = min(Kp0, max_tk)
    Kp = _round_up(Kp0, tk)

    tn = min(_round_up(N, 128), max_tn)
    Np = _round_up(N, tn)

    Mp0 = _round_up(M, 8)
    tm = min(Mp0, max_tm)
    Mp = _round_up(Mp0, tm)
    # Keep at least 2 programs on a parallel axis so both v7x TensorCores work.
    if Mp // tm == 1 and Np // tn == 1 and tm >= 16 and (tm // 2) % 8 == 0:
        tm //= 2

    single_k = (Kp // tk) == 1

    xp = _pad2d(x, Mp, Kp)                       # usually a no-op (pre-padded)
    wp = _pad2d(w, Kp, Np)                       # small (weights)

    args = [xp, wp]
    if single_k:
        in_specs = [
            pl.BlockSpec((tm, tk), lambda i, j: (i, 0)),
            pl.BlockSpec((tk, tn), lambda i, j: (0, j)),
        ]
        out_spec = pl.BlockSpec((tm, tn), lambda i, j: (i, j))
        grid = (Mp // tm, Np // tn)
        dims = ("parallel", "parallel")
        scratch = []
        if residual is not None:
            args.append(_pad2d(residual, Mp, Np))
            in_specs.append(pl.BlockSpec((tm, tn), lambda i, j: (i, j)))
            kernel = functools.partial(_mm_res_kernel_single_k,
                                       tn=tn, relu_cols=relu_cols)
        else:
            kernel = functools.partial(_mm_kernel_single_k,
                                       tn=tn, relu_cols=relu_cols)
    else:
        in_specs = [
            pl.BlockSpec((tm, tk), lambda i, j, k: (i, k)),
            pl.BlockSpec((tk, tn), lambda i, j, k: (k, j)),
        ]
        out_spec = pl.BlockSpec((tm, tn), lambda i, j, k: (i, j))
        grid = (Mp // tm, Np // tn, Kp // tk)
        dims = ("parallel", "parallel", "arbitrary")
        scratch = [pltpu.VMEM((tm, tn), jnp.float32)]
        if residual is not None:
            args.append(_pad2d(residual, Mp, Np))
            in_specs.append(pl.BlockSpec((tm, tn), lambda i, j, k: (i, j)))
            kernel = functools.partial(_mm_res_kernel_tiled_k,
                                       tn=tn, relu_cols=relu_cols)
        else:
            kernel = functools.partial(_mm_kernel_tiled_k,
                                       tn=tn, relu_cols=relu_cols)

    # ---- VMEM budget (double-buffered tiles + accumulator) ----
    tile_bytes = (tm * tk * xp.dtype.itemsize
                  + tk * tn * wp.dtype.itemsize
                  + tm * tn * jnp.dtype(out_dtype).itemsize)
    if residual is not None:
        tile_bytes += tm * tn * args[-1].dtype.itemsize
    vmem_needed = 2 * tile_bytes + (0 if single_k else tm * tn * 4)
    vmem_limit = int(min(max(vmem_needed + (8 << 20), 32 << 20), 64 << 20))

    bytes_in = sum(int(a.size) * a.dtype.itemsize for a in args)
    bytes_out = Mp * Np * jnp.dtype(out_dtype).itemsize
    cost = pl.CostEstimate(flops=2 * Mp * Kp * Np, transcendentals=0,
                           bytes_accessed=bytes_in + bytes_out)

    out = pl.pallas_call(
        kernel,
        out_shape=jax.ShapeDtypeStruct((Mp, Np), out_dtype),
        grid_spec=pltpu.PrefetchScalarGridSpec(
            num_scalar_prefetch=0,
            grid=grid,
            in_specs=in_specs,
            out_specs=out_spec,
            scratch_shapes=scratch,
        ),
        compiler_params=pltpu.CompilerParams(
            dimension_semantics=dims,
            vmem_limit_bytes=vmem_limit),
        cost_estimate=cost,
    )(*args)

    return out[:M, :N]


# ----------------------------------------------------------------------------
# Plain-JAX glue: spectral norm, reflection pad, im2col, weight layout
# ----------------------------------------------------------------------------
def spectral_normalize(w, n_iter=5, eps=1e-12):
    """W / sigma(W), sigma via power iteration on the (Cout, Cin*k*k) matrix."""
    cout = w.shape[0]
    w2 = w.reshape(cout, -1)
    u = jnp.ones((cout,), w.dtype) / jnp.sqrt(jnp.asarray(cout, w.dtype))
    v = None
    for _ in range(n_iter):
        v = w2.T @ u
        v = v / (jnp.linalg.norm(v) + eps)
        u = w2 @ v
        u = u / (jnp.linalg.norm(u) + eps)
    sigma = u @ (w2 @ v)
    return w / sigma


def reflect_pad_nhwc(x, p):
    assert p < x.shape[1] and p < x.shape[2], "reflection pad needs p < H, W"
    return jnp.pad(x, ((0, 0), (p, p), (p, p), (0, 0)), mode="reflect")


def im2col3x3(x_padded_nhwc, dilation, k_pad_to=128):
    """x already padded by `dilation`.  Returns (N*H*W, round_up(9*C, 128)),
    tap order (kh, kw, c); the K zero-pad is appended during the concat so no
    separate full-matrix jnp.pad pass is needed."""
    n, hp, wp, c = x_padded_nhwc.shape
    d = dilation
    h, w = hp - 2 * d, wp - 2 * d
    cols = [x_padded_nhwc[:, kh * d:kh * d + h, kw * d:kw * d + w, :]
            for kh in range(3) for kw in range(3)]
    k = 9 * c
    kp = _round_up(k, k_pad_to)
    if kp != k:
        cols.append(jnp.zeros((n, h, w, kp - k), x_padded_nhwc.dtype))
    return jnp.concatenate(cols, axis=-1).reshape(n * h * w, kp)


def conv3x3_weight(w):
    """(Cout, Cin, 3, 3) -> (9*Cin, Cout), row order (kh, kw, cin)."""
    cout, cin, kh, kw = w.shape
    return jnp.transpose(w, (2, 3, 1, 0)).reshape(kh * kw * cin, cout)


# ----------------------------------------------------------------------------
# ResnetBlock_withshort forward (Pallas)
# ----------------------------------------------------------------------------
def resnet_block_withshort_forward(x_nchw, params, dilation=1):
    w1 = spectral_normalize(params["conv1_w"])
    w2 = spectral_normalize(params["conv2_w"])
    ws = spectral_normalize(params["short_w"])

    cout = w1.shape[0]
    d = dilation

    # NCHW -> NHWC once per block; cast to bf16 BEFORE pad/im2col so the
    # 9x-expanded patches tensors live in bf16 (half the HBM traffic).
    # TODO(synk): keep the surrounding model NHWC to drop these transposes.
    x = jnp.transpose(x_nchw, (0, 2, 3, 1)).astype(jnp.bfloat16)
    n, h, w, _ = x.shape

    # Shared reflection pad + im2col for conv1 and the shortcut conv.
    patches = im2col3x3(reflect_pad_nhwc(x, d), d)          # (M, Kp) bf16

    # conv1 (+ fused ReLU) and shortcut fused into one matmul: W = [W1 | Ws].
    wcat = jnp.concatenate([conv3x3_weight(w1), conv3x3_weight(ws)],
                           axis=1).astype(jnp.bfloat16)
    y = fused_matmul(patches, wcat, relu_cols=cout, out_dtype=jnp.bfloat16)
    y1 = y[:, :cout].reshape(n, h, w, cout)                  # ReLU'd, bf16
    y_short = y[:, cout:2 * cout]                            # bf16 residual

    # conv2: ReflectionPad2d(1) -> 3x3 conv; shortcut residual add fused
    # inside the kernel epilogue (f32), final output f32.
    patches2 = im2col3x3(reflect_pad_nhwc(y1, 1), 1)
    out = fused_matmul(patches2, conv3x3_weight(w2).astype(jnp.bfloat16),
                       residual=y_short, relu_cols=None, out_dtype=jnp.float32)

    out = out.reshape(n, h, w, cout)
    return jnp.transpose(out, (0, 3, 1, 2))                  # NHWC -> NCHW


# ----------------------------------------------------------------------------
# Pure-JAX reference (for correctness check)
# ----------------------------------------------------------------------------
def reference_forward(x, params, dilation=1):
    w1 = spectral_normalize(params["conv1_w"])
    w2 = spectral_normalize(params["conv2_w"])
    ws = spectral_normalize(params["short_w"])

    def refl_pad(a, p):
        return jnp.pad(a, ((0, 0), (0, 0), (p, p), (p, p)), mode="reflect")

    def conv(a, wt, dil):
        return lax.conv_general_dilated(
            a, wt, window_strides=(1, 1), padding="VALID",
            rhs_dilation=(dil, dil),
            dimension_numbers=("NCHW", "OIHW", "NCHW"))

    short = conv(refl_pad(x, dilation), ws, dilation)
    out = jax.nn.relu(conv(refl_pad(x, dilation), w1, dilation))
    out = conv(refl_pad(out, 1), w2, 1)
    return short + out


# ----------------------------------------------------------------------------
# Deterministic parameter init (shapes per ResnetBlock_withshort.__init__)
# ----------------------------------------------------------------------------
def init_params(key, dim, out_dim):
    k1, k2, k3 = jax.random.split(key, 3)
    return dict(
        conv1_w=0.1 * jax.random.normal(k1, (out_dim, dim, 3, 3), jnp.float32),
        conv2_w=0.1 * jax.random.normal(k2, (out_dim, out_dim, 3, 3), jnp.float32),
        short_w=0.1 * jax.random.normal(k3, (out_dim, dim, 3, 3), jnp.float32),
    )


if __name__ == "__main__":
    key = jax.random.PRNGKey(0)
    k_x, k_p = jax.random.split(key)

    N, dim, out_dim, H, W, dilation = 2, 4, 8, 16, 16, 2
    x = jax.random.normal(k_x, (N, dim, H, W), dtype=jnp.float32)
    params = init_params(k_p, dim, out_dim)

    fwd = jax.jit(functools.partial(resnet_block_withshort_forward,
                                    dilation=dilation))
    out = jax.block_until_ready(fwd(x, params))

    ref = jax.block_until_ready(reference_forward(x, params, dilation))
    assert out.shape == (N, out_dim, H, W), out.shape
    max_err = float(jnp.max(jnp.abs(out - ref)))
    # bf16 matmul operands / bf16 intermediates with f32 accumulation
    # -> loosened tolerance vs. a pure-f32 conv.
    assert jnp.allclose(out, ref, atol=5e-2, rtol=5e-2), max_err

    print("KERNEL_OK")
</pallas_src>

<mosaic_0001>
module attributes {stable_mosaic.version = 11 : i64} {
  func.func @_mm_kernel_single_k(%arg0: i32, %arg1: i32, %arg2: memref<256x128xbf16, #tpu.memory_space<vmem>>, %arg3: memref<128x128xbf16, #tpu.memory_space<vmem>>, %arg4: memref<256x128xbf16, #tpu.memory_space<vmem>>) attributes {dimension_semantics = [#tpu.dimension_semantics<parallel>, #tpu.dimension_semantics<parallel>], iteration_bounds = array<i64: 2, 1>, scalar_prefetch = 0 : i64, scratch_operands = 0 : i64, tpu.core_type = #tpu.core_type<tc>, window_params = [{transform_indices = @transform_0, window_bounds = array<i64: 256, 128>}, {transform_indices = @transform_1, window_bounds = array<i64: 128, 128>}, {transform_indices = @transform_2, window_bounds = array<i64: 256, 128>}]} {
    %c0 = arith.constant 0 : index
    %c0_0 = arith.constant 0 : index
    %0 = vector.load %arg2[%c0, %c0_0] : memref<256x128xbf16, #tpu.memory_space<vmem>>, vector<256x128xbf16>
    %c0_1 = arith.constant 0 : index
    %c0_2 = arith.constant 0 : index
    %1 = vector.load %arg3[%c0_1, %c0_2] : memref<128x128xbf16, #tpu.memory_space<vmem>>, vector<128x128xbf16>
    %cst = arith.constant dense<0.000000e+00> : vector<256x128xf32>
    %2 = tpu.matmul %0, %1, %cst {dimension_numbers = #tpu.dot_dimension_numbers<[1], [0], [0], [1], [0, 0, 1, 1], [], []>} : vector<256x128xbf16>, vector<128x128xbf16>, vector<256x128xf32> -> vector<256x128xf32>
    %3 = tpu.iota {dimensions = array<i32: 1>} : vector<256x128xi32>
    %c128_i32 = arith.constant 128 : i32
    %4 = arith.muli %arg1, %c128_i32 : i32
    %5 = vector.broadcast %4 : i32 to vector<256x128xi32>
    %6 = arith.addi %3, %5 : vector<256x128xi32>
    %c8_i32 = arith.constant 8 : i32
    %7 = vector.broadcast %c8_i32 : i32 to vector<256x128xi32>
    %8 = arith.cmpi slt, %6, %7 : vector<256x128xi32>
    %cst_3 = arith.constant 0.000000e+00 : f32
    %9 = vector.broadcast %cst_3 : f32 to vector<256x128xf32>
    %10 = arith.maximumf %2, %9 : vector<256x128xf32>
    %11 = arith.select %8, %10, %2 : vector<256x128xi1>, vector<256x128xf32>
    %12 = arith.truncf %11 : vector<256x128xf32> to vector<256x128xbf16>
    %c0_4 = arith.constant 0 : index
    %c0_5 = arith.constant 0 : index
    %13 = vector.load %arg4[%c0_4, %c0_5] : memref<256x128xbf16, #tpu.memory_space<vmem>>, vector<256x128xbf16>
    tpu.vector_store %arg4[%c0_4, %c0_5], %12 {strides = array<i32>} : memref<256x128xbf16, #tpu.memory_space<vmem>>, vector<256x128xbf16>,
    return
  }
  func.func @transform_0(%arg0: i32, %arg1: i32) -> (i32, i32) {
    %c0_i32 = arith.constant 0 : i32
    %c0_i32_0 = arith.constant 0 : i32
    return %arg0, %c0_i32 : i32, i32
  }
  func.func @transform_1(%arg0: i32, %arg1: i32) -> (i32, i32) {
    %c0_i32 = arith.constant 0 : i32
    %c0_i32_0 = arith.constant 0 : i32
    return %c0_i32, %arg1 : i32, i32
  }
  func.func @transform_2(%arg0: i32, %arg1: i32) -> (i32, i32) {
    %c0_i32 = arith.constant 0 : i32
    return %arg0, %arg1 : i32, i32
  }
}

module attributes {stable_mosaic.version = 11 : i64} {
  func.func @_mm_res_kernel_single_k(%arg0: i32, %arg1: i32, %arg2: memref<256x128xbf16, #tpu.memory_space<vmem>>, %arg3: memref<128x128xbf16, #tpu.memory_space<vmem>>, %arg4: memref<256x128xbf16, #tpu.memory_space<vmem>>, %arg5: memref<256x128xf32, #tpu.memory_space<vmem>>) attributes {dimension_semantics = [#tpu.dimension_semantics<parallel>, #tpu.dimension_semantics<parallel>], iteration_bounds = array<i64: 2, 1>, scalar_prefetch = 0 : i64, scratch_operands = 0 : i64, tpu.core_type = #tpu.core_type<tc>, window_params = [{transform_indices = @transform_0, window_bounds = array<i64: 256, 128>}, {transform_indices = @transform_1, window_bounds = array<i64: 128, 128>}, {transform_indices = @transform_2, window_bounds = array<i64: 256, 128>}, {transform_indices = @transform_3, window_bounds = array<i64: 256, 128>}]} {
    %c0 = arith.constant 0 : index
    %c0_0 = arith.constant 0 : index
    %0 = vector.load %arg2[%c0, %c0_0] : memref<256x128xbf16, #tpu.memory_space<vmem>>, vector<256x128xbf16>
    %c0_1 = arith.constant 0 : index
    %c0_2 = arith.constant 0 : index
    %1 = vector.load %arg3[%c0_1, %c0_2] : memref<128x128xbf16, #tpu.memory_space<vmem>>, vector<128x128xbf16>
    %cst = arith.constant dense<0.000000e+00> : vector<256x128xf32>
    %2 = tpu.matmul %0, %1, %cst {dimension_numbers = #tpu.dot_dimension_numbers<[1], [0], [0], [1], [0, 0, 1, 1], [], []>} : vector<256x128xbf16>, vector<128x128xbf16>, vector<256x128xf32> -> vector<256x128xf32>
    %c0_3 = arith.constant 0 : index
    %c0_4 = arith.constant 0 : index
    %3 = vector.load %arg4[%c0_3, %c0_4] : memref<256x128xbf16, #tpu.memory_space<vmem>>, vector<256x128xbf16>
    %4 = arith.extf %3 : vector<256x128xbf16> to vector<256x128xf32>
    %5 = arith.addf %2, %4 : vector<256x128xf32>
    %c0_5 = arith.constant 0 : index
    %c0_6 = arith.constant 0 : index
    %6 = vector.load %arg5[%c0_5, %c0_6] : memref<256x128xf32, #tpu.memory_space<vmem>>, vector<256x128xf32>
    tpu.vector_store %arg5[%c0_5, %c0_6], %5 {strides = array<i32>} : memref<256x128xf32, #tpu.memory_space<vmem>>, vector<256x128xf32>,
    return
  }
  func.func @transform_0(%arg0: i32, %arg1: i32) -> (i32, i32) {
    %c0_i32 = arith.constant 0 : i32
    %c0_i32_0 = arith.constant 0 : i32
    return %arg0, %c0_i32 : i32, i32
  }
  func.func @transform_1(%arg0: i32, %arg1: i32) -> (i32, i32) {
    %c0_i32 = arith.constant 0 : i32
    %c0_i32_0 = arith.constant 0 : i32
    return %c0_i32, %arg1 : i32, i32
  }
  func.func @transform_2(%arg0: i32, %arg1: i32) -> (i32, i32) {
    %c0_i32 = arith.constant 0 : i32
    return %arg0, %arg1 : i32, i32
  }
  func.func @transform_3(%arg0: i32, %arg1: i32) -> (i32, i32) {
    %c0_i32 = arith.constant 0 : i32
    return %arg0, %arg1 : i32, i32
  }
}

</mosaic_0001>

<bundles_post_ra>
// kernel: resnet_block_withshort_forward.2
= control target key start
LH: loop header
LB: loop body
LE: loop exit
PB: predicated region body
PF: predicated region fallthrough
CT: control target
= control target key end

     0   :  { %s1003_s9 = smov 0   ;;  %s1005_s10 = smov 0   ;;  %s1173_s0 = inlined_call_operand.vmem [shape: bf16[512,128], index: 0, kind: input, shape index: {}]   ;;  %s1174_s1 = inlined_call_operand.vmem [shape: bf16[128,128], index: 1, kind: input, shape index: {}]   ;;  %s1175_s2 = inlined_call_operand.vmem [shape: bf16[512,128], index: 2, kind: output, shape index: {}]  }
   0x1   :  { %s1007_s11 = smov 0  }
   0x2 LB: > { %s24_s12 = sadd.s32 1, %s982_s10  ;;  %p694_p0 = scmp.ge.s32.totalorder %s986_s11, 1  ;;  %s986_s11 = sphi %s1007_s11, %s12_s11   ;;  %s982_s10 = sphi %s1005_s10, %s1177_s10   ;;  %s978_s9 = sphi %s1003_s9, %s1176_s9  }
   0x3   : > { %p26_p1 = scmp.ge.s32.totalorder %s24_s12, 2  ;;  %p136_p2 = scmp.lt.s32.totalorder %s986_s11, 3 }
   0x5   : > { %s1179_s12 = smov (%p26_p1, %s24_s12), 0  ;;  %p137_p3 = pnand %p694_p0, %p136_p2 }
   0x6   : > { %s695_s21 = sshll.u32 (!%p137_p3), %s978_s9, 5 }
   0x7   : > { %140 = sbr.rel (%p137_p3) target bundleno = 240 (0xf0), region = 28  ;;  %p166_p4 = scmp.lt.s32.totalorder (!%p137_p3), %s695_s21, 63 }
   0xc   : > { %v820_v0 = vld [vmem:[%s1174_s1 + $0x38] sm:$0xff]  ;;  %v819_v1 = vld [vmem:[%s1174_s1 + $0x30] sm:$0xff]  ;;  %v818_v2 = vld [vmem:[%s1174_s1 + $0x28] sm:$0xff]  ;;  %s1181_s21 = smov (!%p166_p4, %s695_s21), 63  ;;  %v465_v25 = vlaneseq }
   0xd   : > { %376 = vmatpush.bf16.msra.mxu0 %v820_v0  ;;  %916 = vmatpush.bf16.msra.mxu1 %v820_v0  ;;  %v817_v3 = vld [vmem:[%s1174_s1 + $0x20] sm:$0xff]  ;;  %v816_v4 = vld [vmem:[%s1174_s1 + $0x18] sm:$0xff]  ;;  %v815_v5 = vld [vmem:[%s1174_s1 + $0x10] sm:$0xff]  ;;  %s696_s28 = sshll.u32 %s1181_s21, 2 }
   0xe   : > { %917 = vmatpush.bf16.msra.mxu2 %v820_v0  ;;  %918 = vmatpush.bf16.msra.mxu3 %v820_v0  ;;  %v814_v6 = vld [vmem:[%s1174_s1 + $0x8] sm:$0xff]  ;;  %v813_v7 = vld [vmem:[%s1174_s1] sm:$0xff]  ;;  %s1056_s5 = scalar_lea.vmem %s1173_s0, %s696_s28  ;;  %v1074_v27 = vand.u32 127, %v465_v25  ;;  %s1086_s8 = scalar_lea.vmem %s1175_s2, %s696_s28 }
   0xf   : > { %v797_v8 = vld [vmem:[%s1056_s5] sm:$0xff]  ;;  %v798_v12 = vld [vmem:[%s1056_s5 + $0x8] sm:$0xff]  ;;  %v799_v16 = vld [vmem:[%s1056_s5 + $0x10] sm:$0xff] }
  0x10   : > { %v801_v9 = vld [vmem:[%s1056_s5 + $0x20] sm:$0xff]  ;;  %v802_v13 = vld [vmem:[%s1056_s5 + $0x28] sm:$0xff]  ;;  %v803_v17 = vld [vmem:[%s1056_s5 + $0x30] sm:$0xff]  ;;  %vm470_vm0 = vcmp.lt.s32.totalorder %v1074_v27, 8 }
  0x11   : > { %377 = vmatpush.bf16.msra.mxu0 %v819_v1  ;;  %919 = vmatpush.bf16.msra.mxu1 %v819_v1  ;;  %v805_v10 = vld [vmem:[%s1056_s5 + $0x40] sm:$0xff]  ;;  %v806_v14 = vld [vmem:[%s1056_s5 + $0x48] sm:$0xff]  ;;  %v807_v18 = vld [vmem:[%s1056_s5 + $0x50] sm:$0xff] }
  0x12   : > { %920 = vmatpush.bf16.msra.mxu2 %v819_v1  ;;  %921 = vmatpush.bf16.msra.mxu3 %v819_v1  ;;  %v809_v11 = vld [vmem:[%s1056_s5 + $0x60] sm:$0xff]  ;;  %v810_v15 = vld [vmem:[%s1056_s5 + $0x68] sm:$0xff]  ;;  %v811_v19 = vld [vmem:[%s1056_s5 + $0x70] sm:$0xff] }
  0x13   : > { %v800_v20 = vld [vmem:[%s1056_s5 + $0x18] sm:$0xff] }
  0x14   : > { %v804_v21 = vld [vmem:[%s1056_s5 + $0x38] sm:$0xff] }
  0x15   : > { %378 = vmatpush.bf16.msra.mxu0 %v818_v2  ;;  %922 = vmatpush.bf16.msra.mxu1 %v818_v2  ;;  %v808_v22 = vld [vmem:[%s1056_s5 + $0x58] sm:$0xff] }
  0x16   : > { %923 = vmatpush.bf16.msra.mxu2 %v818_v2  ;;  %924 = vmatpush.bf16.msra.mxu3 %v818_v2  ;;  %v812_v23 = vld [vmem:[%s1056_s5 + $0x78] sm:$0xff] }
  0x19   : > { %379 = vmatpush.bf16.msra.mxu0 %v817_v3  ;;  %925 = vmatpush.bf16.msra.mxu1 %v817_v3 }
  0x1a   : > { %926 = vmatpush.bf16.msra.mxu2 %v817_v3  ;;  %927 = vmatpush.bf16.msra.mxu3 %v817_v3 }
  0x1d   : > { %380 = vmatpush.bf16.msra.mxu0 %v816_v4  ;;  %928 = vmatpush.bf16.msra.mxu1 %v816_v4 }
  0x1e   : > { %929 = vmatpush.bf16.msra.mxu2 %v816_v4  ;;  %930 = vmatpush.bf16.msra.mxu3 %v816_v4 }
  0x21   : > { %381 = vmatpush.bf16.msra.mxu0 %v815_v5  ;;  %931 = vmatpush.bf16.msra.mxu1 %v815_v5 }
  0x22   : > { %932 = vmatpush.bf16.msra.mxu2 %v815_v5  ;;  %933 = vmatpush.bf16.msra.mxu3 %v815_v5 }
  0x25   : > { %382 = vmatpush.bf16.msra.mxu0 %v814_v6  ;;  %934 = vmatpush.bf16.msra.mxu1 %v814_v6 }
  0x26   : > { %935 = vmatpush.bf16.msra.mxu2 %v814_v6  ;;  %936 = vmatpush.bf16.msra.mxu3 %v814_v6 }
  0x29   : > { %383 = vmatpush.bf16.msra.mxu0 %v813_v7  ;;  %937 = vmatpush.bf16.msra.mxu1 %v813_v7 }
  0x2a   : > { %938 = vmatpush.bf16.msra.mxu2 %v813_v7  ;;  %939 = vmatpush.bf16.msra.mxu3 %v813_v7 }
  0x2c   : > { %384 = vmatmul.bf16.vlgmr.msra.gmra.mxu0 %v797_v8  ;;  %404 = vmatmul.bf16.vlgmr.msra.gmra.mxu1 %v801_v9 }
  0x2d   : > { %424 = vmatmul.bf16.vlgmr.msra.gmra.mxu2 %v805_v10  ;;  %444 = vmatmul.bf16.vlgmr.msra.gmra.mxu3 %v809_v11 }
  0x3c   : > { %389 = vmatmul.bf16.gmra.mxu0 %v798_v12  ;;  %409 = vmatmul.bf16.gmra.mxu1 %v802_v13 }
  0x3d   : > { %429 = vmatmul.bf16.gmra.mxu2 %v806_v14  ;;  %449 = vmatmul.bf16.gmra.mxu3 %v810_v15 }
  0x4c   : > { %394 = vmatmul.bf16.gmra.mxu0 %v799_v16  ;;  %414 = vmatmul.bf16.gmra.mxu1 %v803_v17 }
  0x4d   : > { %434 = vmatmul.bf16.gmra.mxu2 %v807_v18  ;;  %454 = vmatmul.bf16.gmra.mxu3 %v811_v19 }
  0x5c   : > { %399 = vmatmul.bf16.gmra.mxu0 %v800_v20  ;;  %419 = vmatmul.bf16.gmra.mxu1 %v804_v21 }
  0x5d   : > { %439 = vmatmul.bf16.gmra.mxu2 %v808_v22  ;;  %459 = vmatmul.bf16.gmra.mxu3 %v812_v23 }
  0xa9   : > { %v385_v24 = vpop.f32.mrf.mxu0  ;;  %v405_v26 = vpop.f32.mrf.mxu1 }
  0xaa   : > { %v471_v28 = vmax.f32 %v385_v24, 0.0  ;;  %v479_v29 = vmax.f32 %v405_v26, 0.0 }
  0xac   : > { %v503_v36 = vsel %vm470_vm0, %v471_v28, %v385_v24  ;;  %v511_v37 = vsel %vm470_vm0, %v479_v29, %v405_v26 }
  0xb0   : > { %v425_v30 = vpop.f32.mrf.mxu2  ;;  %v445_v31 = vpop.f32.mrf.mxu3 }
  0xb1   : > { %v387_v32 = vpop.f32.mrf.mxu0  ;;  %v407_v33 = vpop.f32.mrf.mxu1  ;;  %v487_v42 = vmax.f32 %v425_v30, 0.0  ;;  %v495_v43 = vmax.f32 %v445_v31, 0.0 }
  0xb2   : > { %v472_v34 = vmax.f32 %v387_v32, 0.0  ;;  %v480_v35 = vmax.f32 %v407_v33, 0.0 }
  0xb3   : > { %v519_v50 = vsel %vm470_vm0, %v487_v42, %v425_v30  ;;  %v527_v51 = vsel %vm470_vm0, %v495_v43, %v445_v31 }
  0xb4   : > { %v504_v38 = vsel %vm470_vm0, %v472_v34, %v387_v32  ;;  %v512_v39 = vsel %vm470_vm0, %v480_v35, %v407_v33 }
  0xb5   : > { %v824_v40 = vpack.c.bf16 %v504_v38, %v503_v36  ;;  %v844_v41 = vpack.c.bf16 %v512_v39, %v511_v37 }
  0xb7   : > { %825 = vst [vmem:[%s1086_s8] sm:$0xff] %v824_v40  }
  0xb8   : > { %904 = vst [vmem:[%s1086_s8 + $0x20] sm:$0xff] %v844_v41   ;;  %v427_v44 = vpop.f32.mrf.mxu2  ;;  %v447_v45 = vpop.f32.mrf.mxu3 }
  0xb9   : > { %v488_v46 = vmax.f32 %v427_v44, 0.0  ;;  %v496_v47 = vmax.f32 %v447_v45, 0.0  ;;  %v390_v48 = vpop.f32.mrf.mxu0  ;;  %v410_v49 = vpop.f32.mrf.mxu1 }
  0xba   : > { %v473_v56 = vmax.f32 %v390_v48, 0.0  ;;  %v481_v57 = vmax.f32 %v410_v49, 0.0 }
  0xbb   : > { %v520_v52 = vsel %vm470_vm0, %v488_v46, %v427_v44  ;;  %v528_v53 = vsel %vm470_vm0, %v496_v47, %v447_v45 }
  0xbc   : > { %v864_v54 = vpack.c.bf16 %v520_v52, %v519_v50  ;;  %v884_v55 = vpack.c.bf16 %v528_v53, %v527_v51  ;;  %v505_v0 = vsel %vm470_vm0, %v473_v56, %v390_v48  ;;  %v513_v1 = vsel %vm470_vm0, %v481_v57, %v410_v49 }
  0xbe   : > { %908 = vst [vmem:[%s1086_s8 + $0x40] sm:$0xff] %v864_v54  }
  0xbf   : > { %912 = vst [vmem:[%s1086_s8 + $0x60] sm:$0xff] %v884_v55  }
  0xc0   : > { %v430_v58 = vpop.f32.mrf.mxu2  ;;  %v450_v59 = vpop.f32.mrf.mxu3 }
  0xc1   : > { %v392_v60 = vpop.f32.mrf.mxu0  ;;  %v412_v61 = vpop.f32.mrf.mxu1  ;;  %v489_v6 = vmax.f32 %v430_v58, 0.0  ;;  %v497_v7 = vmax.f32 %v450_v59, 0.0 }
  0xc2   : > { %v474_v62 = vmax.f32 %v392_v60, 0.0  ;;  %v482_v63 = vmax.f32 %v412_v61, 0.0 }
  0xc3   : > { %v521_v14 = vsel %vm470_vm0, %v489_v6, %v430_v58  ;;  %v529_v15 = vsel %vm470_vm0, %v497_v7, %v450_v59 }
  0xc4   : > { %v506_v2 = vsel %vm470_vm0, %v474_v62, %v392_v60  ;;  %v514_v3 = vsel %vm470_vm0, %v482_v63, %v412_v61 }
  0xc5   : > { %v829_v4 = vpack.c.bf16 %v506_v2, %v505_v0  ;;  %v849_v5 = vpack.c.bf16 %v514_v3, %v513_v1 }
  0xc7   : > { %901 = vst [vmem:[%s1086_s8 + $0x8] sm:$0xff] %v829_v4  }
  0xc8   : > { %905 = vst [vmem:[%s1086_s8 + $0x28] sm:$0xff] %v849_v5   ;;  %v432_v8 = vpop.f32.mrf.mxu2  ;;  %v452_v9 = vpop.f32.mrf.mxu3 }
  0xc9   : > { %v490_v10 = vmax.f32 %v432_v8, 0.0  ;;  %v498_v11 = vmax.f32 %v452_v9, 0.0  ;;  %v395_v12 = vpop.f32.mrf.mxu0  ;;  %v415_v13 = vpop.f32.mrf.mxu1 }
  0xca   : > { %v475_v20 = vmax.f32 %v395_v12, 0.0  ;;  %v483_v21 = vmax.f32 %v415_v13, 0.0 }
  0xcb   : > { %v522_v16 = vsel %vm470_vm0, %v490_v10, %v432_v8  ;;  %v530_v17 = vsel %vm470_vm0, %v498_v11, %v452_v9 }
  0xcc   : > { %v869_v18 = vpack.c.bf16 %v522_v16, %v521_v14  ;;  %v889_v19 = vpack.c.bf16 %v530_v17, %v529_v15  ;;  %v507_v29 = vsel %vm470_vm0, %v475_v20, %v395_v12  ;;  %v515_v30 = vsel %vm470_vm0, %v483_v21, %v415_v13 }
  0xce   : > { %909 = vst [vmem:[%s1086_s8 + $0x48] sm:$0xff] %v869_v18  }
  0xcf   : > { %913 = vst [vmem:[%s1086_s8 + $0x68] sm:$0xff] %v889_v19  }
  0xd0   : > { %v435_v22 = vpop.f32.mrf.mxu2  ;;  %v455_v23 = vpop.f32.mrf.mxu3 }
  0xd1   : > { %v397_v24 = vpop.f32.mrf.mxu0  ;;  %v417_v25 = vpop.f32.mrf.mxu1  ;;  %v491_v35 = vmax.f32 %v435_v22, 0.0  ;;  %v499_v36 = vmax.f32 %v455_v23, 0.0 }
  0xd2   : > { %v476_v26 = vmax.f32 %v397_v24, 0.0  ;;  %v484_v28 = vmax.f32 %v417_v25, 0.0 }
  0xd3   : > { %v523_v43 = vsel %vm470_vm0, %v491_v35, %v435_v22  ;;  %v531_v44 = vsel %vm470_vm0, %v499_v36, %v455_v23 }
  0xd4   : > { %v508_v31 = vsel %vm470_vm0, %v476_v26, %v397_v24  ;;  %v516_v32 = vsel %vm470_vm0, %v484_v28, %v417_v25 }
  0xd5   : > { %v834_v33 = vpack.c.bf16 %v508_v31, %v507_v29  ;;  %v854_v34 = vpack.c.bf16 %v516_v32, %v515_v30 }
  0xd7   : > { %902 = vst [vmem:[%s1086_s8 + $0x10] sm:$0xff] %v834_v33  }
  0xd8   : > { %906 = vst [vmem:[%s1086_s8 + $0x30] sm:$0xff] %v854_v34   ;;  %v437_v37 = vpop.f32.mrf.mxu2  ;;  %v457_v38 = vpop.f32.mrf.mxu3 }
  0xd9   : > { %v492_v39 = vmax.f32 %v437_v37, 0.0  ;;  %v500_v40 = vmax.f32 %v457_v38, 0.0  ;;  %v400_v41 = vpop.f32.mrf.mxu0  ;;  %v420_v42 = vpop.f32.mrf.mxu1 }
  0xda   : > { %v477_v49 = vmax.f32 %v400_v41, 0.0  ;;  %v485_v50 = vmax.f32 %v420_v42, 0.0 }
  0xdb   : > { %v524_v45 = vsel %vm470_vm0, %v492_v39, %v437_v37  ;;  %v532_v46 = vsel %vm470_vm0, %v500_v40, %v457_v38 }
  0xdc   : > { %v874_v47 = vpack.c.bf16 %v524_v45, %v523_v43  ;;  %v894_v48 = vpack.c.bf16 %v532_v46, %v531_v44  ;;  %v509_v57 = vsel %vm470_vm0, %v477_v49, %v400_v41  ;;  %v517_v58 = vsel %vm470_vm0, %v485_v50, %v420_v42 }
  0xde   : > { %910 = vst [vmem:[%s1086_s8 + $0x50] sm:$0xff] %v874_v47  }
  0xdf   : > { %914 = vst [vmem:[%s1086_s8 + $0x70] sm:$0xff] %v894_v48  }
  0xe0   : > { %v440_v51 = vpop.f32.mrf.mxu2  ;;  %v460_v52 = vpop.f32.mrf.mxu3 }
  0xe1   : > { %v402_v53 = vpop.f32.mrf.mxu0  ;;  %v422_v54 = vpop.f32.mrf.mxu1  ;;  %v493_v63 = vmax.f32 %v440_v51, 0.0  ;;  %v501_v0 = vmax.f32 %v460_v52, 0.0 }
  0xe2   : > { %v478_v55 = vmax.f32 %v402_v53, 0.0  ;;  %v486_v56 = vmax.f32 %v422_v54, 0.0 }
  0xe3   : > { %v525_v5 = vsel %vm470_vm0, %v493_v63, %v440_v51  ;;  %v533_v6 = vsel %vm470_vm0, %v501_v0, %v460_v52 }
  0xe4   : > { %v510_v59 = vsel %vm470_vm0, %v478_v55, %v402_v53  ;;  %v518_v60 = vsel %vm470_vm0, %v486_v56, %v422_v54 }
  0xe5   : > { %v839_v61 = vpack.c.bf16 %v510_v59, %v509_v57  ;;  %v859_v62 = vpack.c.bf16 %v518_v60, %v517_v58 }
  0xe7   : > { %903 = vst [vmem:[%s1086_s8 + $0x18] sm:$0xff] %v839_v61  }
  0xe8   : > { %907 = vst [vmem:[%s1086_s8 + $0x38] sm:$0xff] %v859_v62   ;;  %v442_v1 = vpop.f32.mrf.mxu2  ;;  %v462_v2 = vpop.f32.mrf.mxu3 }
  0xe9   : > { %v494_v3 = vmax.f32 %v442_v1, 0.0  ;;  %v502_v4 = vmax.f32 %v462_v2, 0.0 }
  0xeb   : > { %v526_v7 = vsel %vm470_vm0, %v494_v3, %v442_v1  ;;  %v534_v8 = vsel %vm470_vm0, %v502_v4, %v462_v2 }
  0xec   : > { %v879_v9 = vpack.c.bf16 %v526_v7, %v525_v5  ;;  %v899_v10 = vpack.c.bf16 %v534_v8, %v533_v6 }
  0xee   : > { %911 = vst [vmem:[%s1086_s8 + $0x58] sm:$0xff] %v879_v9  }
  0xef   : > { %915 = vst [vmem:[%s1086_s8 + $0x78] sm:$0xff] %v899_v10  }
  0xf0 PF: > { %s12_s11 = sadd.s32 1, %s986_s11   ;;  %s1176_s9 = smov %s982_s10 }
  0xf1   : > { %p9_p5 = scmp.ge.s32.totalorder %s12_s11, 4   ;;  %s1177_s10 = smov %s1179_s12 }
  0xf3   :  { %11 = sbr.rel (!%p9_p5) target bundleno = 2 (0x2), region = 61 }

// kernel: resnet_block_withshort_forward.3
= control target key start
LH: loop header
LB: loop body
LE: loop exit
PB: predicated region body
PF: predicated region fallthrough
CT: control target
= control target key end

     0   :  { %s1031_s12 = smov 0   ;;  %s1033_s13 = smov 0   ;;  %s1172_s0 = inlined_call_operand.vmem [shape: bf16[512,128], index: 0, kind: input, shape index: {}]   ;;  %s1173_s1 = inlined_call_operand.vmem [shape: bf16[128,128], index: 1, kind: input, shape index: {}]   ;;  %s1174_s2 = inlined_call_operand.vmem [shape: bf16[512,128], index: 2, kind: input, shape index: {}]   ;;  %s1175_s3 = inlined_call_operand.vmem [shape: f32[512,128], index: 3, kind: output, shape index: {}]  }
   0x1   :  { %s1035_s14 = smov 0  }
   0x2 LB: > { %s25_s15 = sadd.s32 1, %s1005_s13  ;;  %p731_p0 = scmp.ge.s32.totalorder %s1009_s14, 1  ;;  %s1009_s14 = sphi %s1035_s14, %s13_s14   ;;  %s1005_s13 = sphi %s1033_s13, %s1177_s13   ;;  %s1001_s12 = sphi %s1031_s12, %s1176_s12  }
   0x3   : > { %p27_p1 = scmp.ge.s32.totalorder %s25_s15, 2  ;;  %p177_p2 = scmp.lt.s32.totalorder %s1009_s14, 3 }
   0x5   : > { %s1179_s15 = smov (%p27_p1, %s25_s15), 0  ;;  %p178_p3 = pnand %p731_p0, %p177_p2 }
   0x6   : > { %s732_s24 = sshll.u32 (!%p178_p3), %s1001_s12, 5 }
   0x7   : > { %181 = sbr.rel (%p178_p3) target bundleno = 237 (0xed), region = 32  ;;  %p217_p4 = scmp.lt.s32.totalorder (!%p178_p3), %s732_s24, 63 }
   0xc   : > { %v859_v0 = vld [vmem:[%s1173_s1 + $0x38] sm:$0xff]  ;;  %v858_v1 = vld [vmem:[%s1173_s1 + $0x30] sm:$0xff]  ;;  %v857_v2 = vld [vmem:[%s1173_s1 + $0x28] sm:$0xff]  ;;  %s1181_s24 = smov (!%p217_p4, %s732_s24), 63 }
   0xd   : > { %500 = vmatpush.bf16.msra.mxu0 %v859_v0  ;;  %939 = vmatpush.bf16.msra.mxu1 %v859_v0  ;;  %v856_v3 = vld [vmem:[%s1173_s1 + $0x20] sm:$0xff]  ;;  %v855_v4 = vld [vmem:[%s1173_s1 + $0x18] sm:$0xff]  ;;  %v854_v5 = vld [vmem:[%s1173_s1 + $0x10] sm:$0xff]  ;;  %s733_s4 = sshll.u32 %s1181_s24, 2  ;;  %s737_s16 = sshll.u32 %s1181_s24, 3 }
   0xe   : > { %940 = vmatpush.bf16.msra.mxu2 %v859_v0  ;;  %941 = vmatpush.bf16.msra.mxu3 %v859_v0  ;;  %v853_v6 = vld [vmem:[%s1173_s1 + $0x8] sm:$0xff]  ;;  %v852_v7 = vld [vmem:[%s1173_s1] sm:$0xff]  ;;  %s1084_s9 = scalar_lea.vmem %s1172_s0, %s733_s4  ;;  %s1107_s12 = scalar_lea.vmem %s1174_s2, %s733_s4 }
   0xf   : > { %v836_v8 = vld [vmem:[%s1084_s9] sm:$0xff]  ;;  %v837_v12 = vld [vmem:[%s1084_s9 + $0x8] sm:$0xff]  ;;  %v838_v16 = vld [vmem:[%s1084_s9 + $0x10] sm:$0xff]  ;;  %s1115_s19 = scalar_lea.vmem %s1175_s3, %s737_s16 }
  0x10   : > { %v840_v9 = vld [vmem:[%s1084_s9 + $0x20] sm:$0xff]  ;;  %v841_v13 = vld [vmem:[%s1084_s9 + $0x28] sm:$0xff]  ;;  %v842_v17 = vld [vmem:[%s1084_s9 + $0x30] sm:$0xff] }
  0x11   : > { %501 = vmatpush.bf16.msra.mxu0 %v858_v1  ;;  %942 = vmatpush.bf16.msra.mxu1 %v858_v1  ;;  %v844_v10 = vld [vmem:[%s1084_s9 + $0x40] sm:$0xff]  ;;  %v845_v14 = vld [vmem:[%s1084_s9 + $0x48] sm:$0xff]  ;;  %v846_v18 = vld [vmem:[%s1084_s9 + $0x50] sm:$0xff] }
  0x12   : > { %943 = vmatpush.bf16.msra.mxu2 %v858_v1  ;;  %944 = vmatpush.bf16.msra.mxu3 %v858_v1  ;;  %v848_v11 = vld [vmem:[%s1084_s9 + $0x60] sm:$0xff]  ;;  %v849_v15 = vld [vmem:[%s1084_s9 + $0x68] sm:$0xff]  ;;  %v850_v19 = vld [vmem:[%s1084_s9 + $0x70] sm:$0xff] }
  0x13   : > { %v839_v20 = vld [vmem:[%s1084_s9 + $0x18] sm:$0xff]  ;;  %v861_v24 = vld [vmem:[%s1107_s12] sm:$0xff]   ;;  %v924_v46 = vld [vmem:[%s1107_s12 + $0x8] sm:$0xff]  }
  0x14   : > { %v843_v21 = vld [vmem:[%s1084_s9 + $0x38] sm:$0xff]  ;;  %v927_v25 = vld [vmem:[%s1107_s12 + $0x20] sm:$0xff]   ;;  %v862_v26 = vunpack.c.l.bf16 %v861_v24  ;;  %v863_v36 = vunpack.c.h.bf16 %v861_v24  ;;  %v928_v47 = vld [vmem:[%s1107_s12 + $0x28] sm:$0xff]   ;;  %v866_v50 = vunpack.c.l.bf16 %v924_v46  ;;  %v867_v0 = vunpack.c.h.bf16 %v924_v46 }
  0x15   : > { %502 = vmatpush.bf16.msra.mxu0 %v857_v2  ;;  %945 = vmatpush.bf16.msra.mxu1 %v857_v2  ;;  %v847_v22 = vld [vmem:[%s1084_s9 + $0x58] sm:$0xff]  ;;  %v878_v27 = vunpack.c.l.bf16 %v927_v25  ;;  %v931_v32 = vld [vmem:[%s1107_s12 + $0x40] sm:$0xff]   ;;  %v879_v37 = vunpack.c.h.bf16 %v927_v25  ;;  %v882_v51 = vunpack.c.l.bf16 %v928_v47  ;;  %v932_v60 = vld [vmem:[%s1107_s12 + $0x48] sm:$0xff]   ;;  %v883_v1 = vunpack.c.h.bf16 %v928_v47 }
  0x16   : > { %946 = vmatpush.bf16.msra.mxu2 %v857_v2  ;;  %947 = vmatpush.bf16.msra.mxu3 %v857_v2  ;;  %v851_v23 = vld [vmem:[%s1084_s9 + $0x78] sm:$0xff]  ;;  %v935_v33 = vld [vmem:[%s1107_s12 + $0x60] sm:$0xff]   ;;  %v894_v34 = vunpack.c.l.bf16 %v931_v32  ;;  %v895_v48 = vunpack.c.h.bf16 %v931_v32  ;;  %v936_v61 = vld [vmem:[%s1107_s12 + $0x68] sm:$0xff]   ;;  %v898_v62 = vunpack.c.l.bf16 %v932_v60 }
  0x17   : > { %v910_v35 = vunpack.c.l.bf16 %v935_v33  ;;  %v911_v49 = vunpack.c.h.bf16 %v935_v33  ;;  %v914_v63 = vunpack.c.l.bf16 %v936_v61  ;;  %v933_v24 = vld [vmem:[%s1107_s12 + $0x50] sm:$0xff]  }
  0x18   : > { %v937_v25 = vld [vmem:[%s1107_s12 + $0x70] sm:$0xff]  }
  0x19   : > { %503 = vmatpush.bf16.msra.mxu0 %v856_v3  ;;  %948 = vmatpush.bf16.msra.mxu1 %v856_v3 }
  0x1a   : > { %949 = vmatpush.bf16.msra.mxu2 %v856_v3  ;;  %950 = vmatpush.bf16.msra.mxu3 %v856_v3 }
  0x1d   : > { %504 = vmatpush.bf16.msra.mxu0 %v855_v4  ;;  %951 = vmatpush.bf16.msra.mxu1 %v855_v4 }
  0x1e   : > { %952 = vmatpush.bf16.msra.mxu2 %v855_v4  ;;  %953 = vmatpush.bf16.msra.mxu3 %v855_v4 }
  0x21   : > { %505 = vmatpush.bf16.msra.mxu0 %v854_v5  ;;  %954 = vmatpush.bf16.msra.mxu1 %v854_v5 }
  0x22   : > { %955 = vmatpush.bf16.msra.mxu2 %v854_v5  ;;  %956 = vmatpush.bf16.msra.mxu3 %v854_v5 }
  0x25   : > { %506 = vmatpush.bf16.msra.mxu0 %v853_v6  ;;  %957 = vmatpush.bf16.msra.mxu1 %v853_v6 }
  0x26   : > { %958 = vmatpush.bf16.msra.mxu2 %v853_v6  ;;  %959 = vmatpush.bf16.msra.mxu3 %v853_v6 }
  0x29   : > { %507 = vmatpush.bf16.msra.mxu0 %v852_v7  ;;  %960 = vmatpush.bf16.msra.mxu1 %v852_v7 }
  0x2a   : > { %961 = vmatpush.bf16.msra.mxu2 %v852_v7  ;;  %962 = vmatpush.bf16.msra.mxu3 %v852_v7 }
  0x2c   : > { %508 = vmatmul.bf16.vlgmr.msra.gmra.mxu0 %v836_v8  ;;  %528 = vmatmul.bf16.vlgmr.msra.gmra.mxu1 %v840_v9 }
  0x2d   : > { %548 = vmatmul.bf16.vlgmr.msra.gmra.mxu2 %v844_v10  ;;  %568 = vmatmul.bf16.vlgmr.msra.gmra.mxu3 %v848_v11  ;;  %v925_v10 = vld [vmem:[%s1107_s12 + $0x10] sm:$0xff]  }
  0x2e   : > { %v929_v11 = vld [vmem:[%s1107_s12 + $0x30] sm:$0xff]  }
  0x3c   : > { %513 = vmatmul.bf16.gmra.mxu0 %v837_v12  ;;  %533 = vmatmul.bf16.gmra.mxu1 %v841_v13  ;;  %v899_v12 = vunpack.c.h.bf16 %v932_v60  ;;  %v915_v13 = vunpack.c.h.bf16 %v936_v61 }
  0x3d   : > { %553 = vmatmul.bf16.gmra.mxu2 %v845_v14  ;;  %573 = vmatmul.bf16.gmra.mxu3 %v849_v15  ;;  %v870_v14 = vunpack.c.l.bf16 %v925_v10  ;;  %v886_v15 = vunpack.c.l.bf16 %v929_v11 }
  0x4c   : > { %518 = vmatmul.bf16.gmra.mxu0 %v838_v16  ;;  %538 = vmatmul.bf16.gmra.mxu1 %v842_v17 }
  0x4d   : > { %558 = vmatmul.bf16.gmra.mxu2 %v846_v18  ;;  %578 = vmatmul.bf16.gmra.mxu3 %v850_v19 }
  0x5c   : > { %523 = vmatmul.bf16.gmra.mxu0 %v839_v20  ;;  %543 = vmatmul.bf16.gmra.mxu1 %v843_v21 }
  0x5d   : > { %563 = vmatmul.bf16.gmra.mxu2 %v847_v22  ;;  %583 = vmatmul.bf16.gmra.mxu3 %v851_v23 }
  0xa9   : > { %v509_v28 = vpop.f32.mrf.mxu0  ;;  %v529_v29 = vpop.f32.mrf.mxu1 }
  0xaa   : > { %v510_v30 = vadd.f32 %v862_v26, %v509_v28  ;;  %v530_v31 = vadd.f32 %v878_v27, %v529_v29  ;;  %v902_v26 = vunpack.c.l.bf16 %v933_v24  ;;  %v918_v27 = vunpack.c.l.bf16 %v937_v25 }
  0xab   : > { %v871_v28 = vunpack.c.h.bf16 %v925_v10  ;;  %v887_v29 = vunpack.c.h.bf16 %v929_v11 }
  0xac   : > { %589 = vst [vmem:[%s1115_s19] sm:$0xff] %v510_v30 }
  0xad   : > { %597 = vst [vmem:[%s1115_s19 + $0x40] sm:$0xff] %v530_v31 }
  0xb0   : > { %v549_v38 = vpop.f32.mrf.mxu2  ;;  %v569_v39 = vpop.f32.mrf.mxu3 }
  0xb1   : > { %v550_v40 = vadd.f32 %v894_v34, %v549_v38  ;;  %v570_v41 = vadd.f32 %v910_v35, %v569_v39  ;;  %v511_v42 = vpop.f32.mrf.mxu0  ;;  %v531_v43 = vpop.f32.mrf.mxu1  ;;  %v926_v38 = vld [vmem:[%s1107_s12 + $0x18] sm:$0xff]  }
  0xb2   : > { %v512_v44 = vadd.f32 %v863_v36, %v511_v42  ;;  %v532_v45 = vadd.f32 %v879_v37, %v531_v43  ;;  %v930_v39 = vld [vmem:[%s1107_s12 + $0x38] sm:$0xff]   ;;  %v874_v42 = vunpack.c.l.bf16 %v926_v38 }
  0xb3   : > { %605 = vst [vmem:[%s1115_s19 + $0x80] sm:$0xff] %v550_v40  ;;  %v903_v40 = vunpack.c.h.bf16 %v933_v24  ;;  %v890_v43 = vunpack.c.l.bf16 %v930_v39 }
  0xb4   : > { %613 = vst [vmem:[%s1115_s19 + $0xc0] sm:$0xff] %v570_v41  ;;  %v919_v41 = vunpack.c.h.bf16 %v937_v25 }
  0xb5   : > { %590 = vst [vmem:[%s1115_s19 + $0x8] sm:$0xff] %v512_v44 }
  0xb6   : > { %598 = vst [vmem:[%s1115_s19 + $0x48] sm:$0xff] %v532_v45 }
  0xb8   : > { %v551_v52 = vpop.f32.mrf.mxu2  ;;  %v571_v53 = vpop.f32.mrf.mxu3 }
  0xb9   : > { %v552_v54 = vadd.f32 %v895_v48, %v551_v52  ;;  %v572_v55 = vadd.f32 %v911_v49, %v571_v53  ;;  %v514_v56 = vpop.f32.mrf.mxu0  ;;  %v534_v57 = vpop.f32.mrf.mxu1  ;;  %v934_v52 = vld [vmem:[%s1107_s12 + $0x58] sm:$0xff]  }
  0xba   : > { %v515_v58 = vadd.f32 %v866_v50, %v514_v56  ;;  %v535_v59 = vadd.f32 %v882_v51, %v534_v57  ;;  %v938_v53 = vld [vmem:[%s1107_s12 + $0x78] sm:$0xff]   ;;  %v875_v56 = vunpack.c.h.bf16 %v926_v38  ;;  %v891_v57 = vunpack.c.h.bf16 %v930_v39 }
  0xbb   : > { %606 = vst [vmem:[%s1115_s19 + $0x88] sm:$0xff] %v552_v54  ;;  %v906_v54 = vunpack.c.l.bf16 %v934_v52 }
  0xbc   : > { %614 = vst [vmem:[%s1115_s19 + $0xc8] sm:$0xff] %v572_v55  ;;  %v922_v55 = vunpack.c.l.bf16 %v938_v53 }
  0xbd   : > { %591 = vst [vmem:[%s1115_s19 + $0x10] sm:$0xff] %v515_v58 }
  0xbe   : > { %599 = vst [vmem:[%s1115_s19 + $0x50] sm:$0xff] %v535_v59 }
  0xc0   : > { %v554_v2 = vpop.f32.mrf.mxu2  ;;  %v574_v3 = vpop.f32.mrf.mxu3 }
  0xc1   : > { %v555_v4 = vadd.f32 %v898_v62, %v554_v2  ;;  %v575_v5 = vadd.f32 %v914_v63, %v574_v3  ;;  %v516_v6 = vpop.f32.mrf.mxu0  ;;  %v536_v7 = vpop.f32.mrf.mxu1  ;;  %v907_v2 = vunpack.c.h.bf16 %v934_v52  ;;  %v923_v3 = vunpack.c.h.bf16 %v938_v53 }
  0xc2   : > { %v517_v8 = vadd.f32 %v867_v0, %v516_v6  ;;  %v537_v9 = vadd.f32 %v883_v1, %v536_v7 }
  0xc3   : > { %607 = vst [vmem:[%s1115_s19 + $0x90] sm:$0xff] %v555_v4 }
  0xc4   : > { %615 = vst [vmem:[%s1115_s19 + $0xd0] sm:$0xff] %v575_v5 }
  0xc5   : > { %592 = vst [vmem:[%s1115_s19 + $0x18] sm:$0xff] %v517_v8 }
  0xc6   : > { %600 = vst [vmem:[%s1115_s19 + $0x58] sm:$0xff] %v537_v9 }
  0xc8   : > { %v556_v16 = vpop.f32.mrf.mxu2  ;;  %v576_v17 = vpop.f32.mrf.mxu3 }
  0xc9   : > { %v557_v18 = vadd.f32 %v899_v12, %v556_v16  ;;  %v577_v19 = vadd.f32 %v915_v13, %v576_v17  ;;  %v519_v20 = vpop.f32.mrf.mxu0  ;;  %v539_v21 = vpop.f32.mrf.mxu1 }
  0xca   : > { %v520_v22 = vadd.f32 %v870_v14, %v519_v20  ;;  %v540_v23 = vadd.f32 %v886_v15, %v539_v21 }
  0xcb   : > { %608 = vst [vmem:[%s1115_s19 + $0x98] sm:$0xff] %v557_v18 }
  0xcc   : > { %616 = vst [vmem:[%s1115_s19 + $0xd8] sm:$0xff] %v577_v19 }
  0xcd   : > { %593 = vst [vmem:[%s1115_s19 + $0x20] sm:$0xff] %v520_v22 }
  0xce   : > { %601 = vst [vmem:[%s1115_s19 + $0x60] sm:$0xff] %v540_v23 }
  0xd0   : > { %v559_v30 = vpop.f32.mrf.mxu2  ;;  %v579_v31 = vpop.f32.mrf.mxu3 }
  0xd1   : > { %v560_v32 = vadd.f32 %v902_v26, %v559_v30  ;;  %v580_v33 = vadd.f32 %v918_v27, %v579_v31  ;;  %v521_v34 = vpop.f32.mrf.mxu0  ;;  %v541_v35 = vpop.f32.mrf.mxu1 }
  0xd2   : > { %v522_v36 = vadd.f32 %v871_v28, %v521_v34  ;;  %v542_v37 = vadd.f32 %v887_v29, %v541_v35 }
  0xd3   : > { %609 = vst [vmem:[%s1115_s19 + $0xa0] sm:$0xff] %v560_v32 }
  0xd4   : > { %617 = vst [vmem:[%s1115_s19 + $0xe0] sm:$0xff] %v580_v33 }
  0xd5   : > { %594 = vst [vmem:[%s1115_s19 + $0x28] sm:$0xff] %v522_v36 }
  0xd6   : > { %602 = vst [vmem:[%s1115_s19 + $0x68] sm:$0xff] %v542_v37 }
  0xd8   : > { %v561_v44 = vpop.f32.mrf.mxu2  ;;  %v581_v45 = vpop.f32.mrf.mxu3 }
  0xd9   : > { %v562_v46 = vadd.f32 %v903_v40, %v561_v44  ;;  %v582_v47 = vadd.f32 %v919_v41, %v581_v45  ;;  %v524_v48 = vpop.f32.mrf.mxu0  ;;  %v544_v49 = vpop.f32.mrf.mxu1 }
  0xda   : > { %v525_v50 = vadd.f32 %v874_v42, %v524_v48  ;;  %v545_v51 = vadd.f32 %v890_v43, %v544_v49 }
  0xdb   : > { %610 = vst [vmem:[%s1115_s19 + $0xa8] sm:$0xff] %v562_v46 }
  0xdc   : > { %618 = vst [vmem:[%s1115_s19 + $0xe8] sm:$0xff] %v582_v47 }
  0xdd   : > { %595 = vst [vmem:[%s1115_s19 + $0x30] sm:$0xff] %v525_v50 }
  0xde   : > { %603 = vst [vmem:[%s1115_s19 + $0x70] sm:$0xff] %v545_v51 }
  0xe0   : > { %v564_v58 = vpop.f32.mrf.mxu2  ;;  %v584_v59 = vpop.f32.mrf.mxu3 }
  0xe1   : > { %v565_v60 = vadd.f32 %v906_v54, %v564_v58  ;;  %v585_v61 = vadd.f32 %v922_v55, %v584_v59  ;;  %v526_v62 = vpop.f32.mrf.mxu0  ;;  %v546_v63 = vpop.f32.mrf.mxu1 }
  0xe2   : > { %v527_v0 = vadd.f32 %v875_v56, %v526_v62  ;;  %v547_v1 = vadd.f32 %v891_v57, %v546_v63 }
  0xe3   : > { %611 = vst [vmem:[%s1115_s19 + $0xb0] sm:$0xff] %v565_v60 }
  0xe4   : > { %619 = vst [vmem:[%s1115_s19 + $0xf0] sm:$0xff] %v585_v61 }
  0xe5   : > { %596 = vst [vmem:[%s1115_s19 + $0x38] sm:$0xff] %v527_v0 }
  0xe6   : > { %604 = vst [vmem:[%s1115_s19 + $0x78] sm:$0xff] %v547_v1 }
  0xe8   : > { %v566_v4 = vpop.f32.mrf.mxu2  ;;  %v586_v5 = vpop.f32.mrf.mxu3 }
  0xe9   : > { %v567_v6 = vadd.f32 %v907_v2, %v566_v4  ;;  %v587_v7 = vadd.f32 %v923_v3, %v586_v5 }
  0xeb   : > { %612 = vst [vmem:[%s1115_s19 + $0xb8] sm:$0xff] %v567_v6 }
  0xec   : > { %620 = vst [vmem:[%s1115_s19 + $0xf8] sm:$0xff] %v587_v7 }
  0xed PF: > { %s13_s14 = sadd.s32 1, %s1009_s14   ;;  %s1176_s12 = smov %s1005_s13 }
  0xee   : > { %p10_p5 = scmp.ge.s32.totalorder %s13_s14, 4   ;;  %s1177_s13 = smov %s1179_s15 }
  0xf0   :  { %12 = sbr.rel (!%p10_p5) target bundleno = 2 (0x2), region = 68 }

</bundles_post_ra>
